<compile_context>
chip_gen: v7x
topology: tpu7x:2x2x1
jax: 0.10.0
libtpu: 0.0.40
codegen_flags: <defaults>
</compile_context>

<pallas_src>
import math
import functools

import jax
import jax.numpy as jnp
from jax import lax
from jax.experimental import pallas as pl
from jax.experimental.pallas import tpu as pltpu


# Contract the LAST dim of both operands (i.e. x @ w.T without any transpose op).
_DN_T = (((1,), (1,)), ((), ()))


# ---------------------------- fused Pallas kernel ----------------------------

def _fused_mha_kernel(h_ref, g_ref, l_ref, bias_ref,
                      wqkv_ref, bqkv_ref, wg_ref, bg_ref, wl_ref, bl_ref,
                      wo_ref, bo_ref, o_ref, z_acc, *, head_dim):
    """One (batch, head) grid step: per-head projections + enriched attention,
    accumulating the output projection into z_acc; epilogue at the last head."""
    hh = pl.program_id(1)
    n_heads = pl.num_programs(1)
    dh = head_dim

    @pl.when(hh == 0)
    def _init():
        z_acc[...] = jnp.zeros_like(z_acc)

    hb = h_ref[0]            # (S, hidden)  bf16, resident across the head axis
    lb = l_ref[0]            # (S, L)       bf16
    gb = g_ref[0]            # (1, G)       bf16
    bias_row = bias_ref[0]   # (1, S)       f32, -1e9 on masked key positions

    # Per-head stacked q/k/v projection: (S, hidden) @ (hidden, 3dh) -> (S, 3dh).
    # Wq/bq already carry the 1/sqrt(dh) score scale (folded in the wrapper).
    qkv = lax.dot_general(hb, wqkv_ref[0], _DN_T, preferred_element_type=jnp.float32)
    qkv = jnp.maximum(qkv + bqkv_ref[0], 0.0)                       # f32
    q_h = qkv[:, 0:dh]                                              # (S, dh) (pre-scaled)
    k_h = qkv[:, dh:2 * dh]                                         # (S, dh)
    v_h = qkv[:, 2 * dh:3 * dh].astype(jnp.bfloat16)                # (S, dh)

    # Local / global projections (weights carry sqrt(scale)).
    lp_h = lax.dot_general(lb, wl_ref[0], _DN_T, preferred_element_type=jnp.float32)
    lp_h = jnp.maximum(lp_h + bl_ref[0], 0.0)                       # (S, dh)
    gp_h = lax.dot_general(gb, wg_ref[0], _DN_T, preferred_element_type=jnp.float32)
    gp_h = jnp.maximum(gp_h + bg_ref[0], 0.0)                       # (1, dh)
    g_sq = jnp.sum(gp_h * gp_h, axis=-1, keepdims=True)             # (1, 1)

    # Enriched scores with ONE fused contraction (K = 2*dh):
    #   [q|g|l] @ [k|g|l]^T == q@k^T + l@l^T + ||g||^2   (block-aligned concat)
    ql = jnp.concatenate([q_h, lp_h], axis=-1).astype(jnp.bfloat16)  # (S, 2dh)
    kl = jnp.concatenate([k_h, lp_h], axis=-1).astype(jnp.bfloat16)  # (S, 2dh)
    s = lax.dot_general(ql, kl, _DN_T, preferred_element_type=jnp.float32)  # (S, S) f32
    s = s + (bias_row + g_sq)           # single (S,S) VPU add (mask bias + rank-0 term)

    # Numerically stable softmax (f32 on the VPU); normalization deferred past PV.
    s = s - jnp.max(s, axis=-1, keepdims=True)
    p = jnp.exp(s)
    r = jnp.sum(p, axis=-1, keepdims=True)                           # (S, 1)
    y_h = jnp.dot(p.astype(jnp.bfloat16), v_h, preferred_element_type=jnp.float32)
    y_h = y_h * pl.reciprocal(r, approx=True)                        # (S, dh) f32

    # Per-head slice of the output projection, accumulated into (S, hidden_pad).
    z_acc[...] += lax.dot_general(y_h.astype(jnp.bfloat16), wo_ref[0], _DN_T,
                                  preferred_element_type=jnp.float32)

    @pl.when(hh == n_heads - 1)
    def _finalize():
        z = jnp.maximum(z_acc[...] + bo_ref[...], 0.0)               # (S, hidden_pad)
        o_ref[0] = jnp.sum(z, axis=0, keepdims=True).astype(o_ref.dtype)


# ---------------------------- wrapper ----------------------------

def multi_head_attention_forward(params, h, mask, g, l, head_num):
    B, S, hidden = h.shape
    A = params["wq"].shape[0]
    dh = A // head_num
    G = params["wg"].shape[1]
    L = params["wl"].shape[1]
    hidden_pad = ((hidden + 127) // 128) * 128   # lane-dense output stores

    f32, bf16 = jnp.float32, jnp.bfloat16
    scale = 1.0 / math.sqrt(dh)
    rs = math.sqrt(scale)    # split between both sides of the l/g score blocks

    # Per-head weight stacks (leading head axis -> indexed by the head grid axis,
    # so the kernel never needs dynamic lane-dim slicing).
    wq_s = (params["wq"] * scale).reshape(head_num, dh, hidden)
    wk = params["wk"].reshape(head_num, dh, hidden)
    wv = params["wv"].reshape(head_num, dh, hidden)
    wqkv_h = jnp.concatenate([wq_s, wk, wv], axis=1).astype(bf16)        # (H, 3dh, hidden)

    bq_s = (params["bq"] * scale).reshape(head_num, dh)
    bk = params["bk"].reshape(head_num, dh)
    bv = params["bv"].reshape(head_num, dh)
    bqkv_h = jnp.concatenate([bq_s, bk, bv], axis=1)[:, None, :].astype(f32)  # (H, 1, 3dh)

    wg_h = (params["wg"] * rs).reshape(head_num, dh, G).astype(bf16)     # (H, dh, G)
    bg_h = (params["bg"] * rs).reshape(head_num, 1, dh).astype(f32)
    wl_h = (params["wl"] * rs).reshape(head_num, dh, L).astype(bf16)     # (H, dh, L)
    bl_h = (params["bl"] * rs).reshape(head_num, 1, dh).astype(f32)

    wo_pad = jnp.zeros((hidden_pad, A), f32).at[:hidden].set(params["wo"])
    wo_h = wo_pad.reshape(hidden_pad, head_num, dh).transpose(1, 0, 2).astype(bf16)
    bo_pad = jnp.zeros((1, hidden_pad), f32).at[:, :hidden].set(params["bo"])

    # Additive mask bias, one row per (batch, head) grid step.  Reproduces the source
    # model's head-major flattening quirk: step i = b*H + h uses mask[(b*H+h) % B].
    b_idx = (jnp.arange(B)[:, None] * head_num + jnp.arange(head_num)[None, :]) % B
    bias_bh = (mask[b_idx] * (-1e9)).astype(f32).reshape(B * head_num, 1, S)

    # bf16 MXU operands at the call boundary (halves HBM/DMA and VMEM for activations).
    h_b = h.astype(bf16)
    l_b = l.astype(bf16)
    g_b = g.reshape(B, 1, G).astype(bf16)

    kernel = functools.partial(_fused_mha_kernel, head_dim=dh)

    out = pl.pallas_call(
        kernel,
        out_shape=jax.ShapeDtypeStruct((B, 1, hidden_pad), f32),
        grid=(B, head_num),
        in_specs=[
            pl.BlockSpec((1, S, hidden), lambda b, hh: (b, 0, 0)),           # h
            pl.BlockSpec((1, 1, G), lambda b, hh: (b, 0, 0)),                # g
            pl.BlockSpec((1, S, L), lambda b, hh: (b, 0, 0)),                # l
            pl.BlockSpec((1, 1, S), lambda b, hh: (b * head_num + hh, 0, 0)),  # mask bias
            pl.BlockSpec((1, 3 * dh, hidden), lambda b, hh: (hh, 0, 0)),     # Wqkv (head)
            pl.BlockSpec((1, 1, 3 * dh), lambda b, hh: (hh, 0, 0)),          # bqkv (head)
            pl.BlockSpec((1, dh, G), lambda b, hh: (hh, 0, 0)),              # Wg   (head)
            pl.BlockSpec((1, 1, dh), lambda b, hh: (hh, 0, 0)),              # bg   (head)
            pl.BlockSpec((1, dh, L), lambda b, hh: (hh, 0, 0)),              # Wl   (head)
            pl.BlockSpec((1, 1, dh), lambda b, hh: (hh, 0, 0)),              # bl   (head)
            pl.BlockSpec((1, hidden_pad, dh), lambda b, hh: (hh, 0, 0)),     # Wo   (head)
            pl.BlockSpec((1, hidden_pad), lambda b, hh: (0, 0)),             # bo (padded)
        ],
        out_specs=pl.BlockSpec((1, 1, hidden_pad), lambda b, hh: (b, 0, 0)),
        scratch_shapes=[pltpu.VMEM((S, hidden_pad), jnp.float32)],           # z accumulator
        compiler_params=pltpu.CompilerParams(
            dimension_semantics=("parallel", "arbitrary"),
            vmem_limit_bytes=48 * 1024 * 1024),
    )(h_b, g_b, l_b, bias_bh,
      wqkv_h, bqkv_h, wg_h, bg_h, wl_h, bl_h, wo_h, bo_pad)

    o = out[:, 0, :hidden]
    return o, o


# ---------------------------- params ----------------------------

def init_params(key, hidden, attn, local_size, global_size):
    keys = jax.random.split(key, 12)

    def lin(kw, kb, out_f, in_f):
        bound = 1.0 / math.sqrt(in_f)
        w = jax.random.uniform(kw, (out_f, in_f), jnp.float32, -bound, bound)
        b = jax.random.uniform(kb, (out_f,), jnp.float32, -bound, bound)
        return w, b

    p = {}
    p["wq"], p["bq"] = lin(keys[0], keys[1], attn, hidden)
    p["wk"], p["bk"] = lin(keys[2], keys[3], attn, hidden)
    p["wv"], p["bv"] = lin(keys[4], keys[5], attn, hidden)
    p["wg"], p["bg"] = lin(keys[6], keys[7], attn, global_size)
    p["wl"], p["bl"] = lin(keys[8], keys[9], attn, local_size)
    p["wo"], p["bo"] = lin(keys[10], keys[11], hidden, attn)
    return p


# ---------------------------- pure-JAX reference (faithful, f32) ----------------------------

def reference_forward(params, h, mask, g, l, head_num):
    B, S, hidden = h.shape
    A = params["wq"].shape[0]
    dh = A // head_num
    relu = lambda x: jnp.maximum(x, 0.0)
    lin = lambda x, w, b: x @ w.T + b
    q = relu(lin(h, params["wq"], params["bq"]))
    k = relu(lin(h, params["wk"], params["bk"]))
    v = relu(lin(h, params["wv"], params["bv"]))
    gp = relu(lin(g, params["wg"], params["bg"]))
    gp = jnp.broadcast_to(gp[:, None, :], (B, S, A))
    lp = relu(lin(l, params["wl"], params["bl"]))

    def to_b(x):
        return x.reshape(B, S, head_num, dh).transpose(0, 2, 1, 3).reshape(B * head_num, S, dh)

    qb, kb, vb, gb, lb = (to_b(t) for t in (q, k, v, gp, lp))
    pq = jnp.concatenate([qb, gb, lb], axis=2)
    pk = jnp.concatenate([kb, gb, lb], axis=2)
    scores = jnp.einsum("bqd,bkd->bqk", pq, pk) / math.sqrt(dh)
    mask_flat = jnp.tile(mask[None, :, :], (head_num, 1, 1)).reshape(head_num * B, 1, S)
    scores = jnp.where(mask_flat == 1.0, -1000000000.0, scores)
    attn = jax.nn.softmax(scores, axis=-1)
    yb = jnp.einsum("bqk,bkd->bqd", attn, vb)
    y = yb.reshape(B, head_num, S, dh).transpose(0, 2, 1, 3).reshape(B, S, A)
    o = jnp.sum(relu(lin(y, params["wo"], params["bo"])), axis=1)
    return o


# ---------------------------- main ----------------------------

if __name__ == "__main__":
    B, S = 2, 8
    hidden, attn_size, head_num = 32, 32, 4
    local_size, global_size = 16, 16

    key = jax.random.PRNGKey(0)
    kp, kh, km, kg, kl = jax.random.split(key, 5)
    params = init_params(kp, hidden, attn_size, local_size, global_size)

    h = jax.random.normal(kh, (B, S, hidden), jnp.float32)
    mask = (jax.random.uniform(km, (B, S)) > 0.7).astype(jnp.float32)  # 1 = masked key
    # Keep at least one unmasked key per row: the kernel uses an additive -1e9 bias
    # (review item 8), which matches masked_fill exactly except in the degenerate
    # fully-masked-row case (where the source model degrades to a uniform average).
    mask = mask.at[:, 0].set(0.0)
    g = jax.random.normal(kg, (B, global_size), jnp.float32)
    l = jax.random.normal(kl, (B, S, local_size), jnp.float32)

    o, o_dup = multi_head_attention_forward(params, h, mask, g, l, head_num)
    o = jax.block_until_ready(o)

    ref = reference_forward(params, h, mask, g, l, head_num)
    max_err = float(jnp.max(jnp.abs(o - ref)))
    denom = float(jnp.max(jnp.abs(ref))) + 1e-6
    # bf16 MXU operands + approx reciprocal => compare against the f32 reference with
    # a relative-to-max tolerance (re-derived per the review's validation note).
    assert max_err / denom < 0.05, f"max_err={max_err}, max_ref={denom}"

    print("KERNEL_OK")
</pallas_src>

<mosaic_0001>
module attributes {stable_mosaic.version = 11 : i64} {
  func.func @_fused_mha_kernel(%arg0: i32, %arg1: i32, %arg2: memref<1x8x32xbf16, #tpu.memory_space<vmem>>, %arg3: memref<1x1x16xbf16, #tpu.memory_space<vmem>>, %arg4: memref<1x8x16xbf16, #tpu.memory_space<vmem>>, %arg5: memref<1x1x8xf32, #tpu.memory_space<vmem>>, %arg6: memref<1x24x32xbf16, #tpu.memory_space<vmem>>, %arg7: memref<1x1x24xf32, #tpu.memory_space<vmem>>, %arg8: memref<1x8x16xbf16, #tpu.memory_space<vmem>>, %arg9: memref<1x1x8xf32, #tpu.memory_space<vmem>>, %arg10: memref<1x8x16xbf16, #tpu.memory_space<vmem>>, %arg11: memref<1x1x8xf32, #tpu.memory_space<vmem>>, %arg12: memref<1x128x8xbf16, #tpu.memory_space<vmem>>, %arg13: memref<1x128xf32, #tpu.memory_space<vmem>>, %arg14: memref<1x1x128xf32, #tpu.memory_space<vmem>>, %arg15: memref<8x128xf32, #tpu.memory_space<vmem>>) attributes {dimension_semantics = [#tpu.dimension_semantics<parallel>, #tpu.dimension_semantics<arbitrary>], iteration_bounds = array<i64: 2, 4>, scalar_prefetch = 0 : i64, scratch_operands = 1 : i64, tpu.core_type = #tpu.core_type<tc>, window_params = [{transform_indices = @transform_0, window_bounds = array<i64: 1, 8, 32>}, {transform_indices = @transform_1, window_bounds = array<i64: 1, 1, 16>}, {transform_indices = @transform_2, window_bounds = array<i64: 1, 8, 16>}, {transform_indices = @transform_3, window_bounds = array<i64: 1, 1, 8>}, {transform_indices = @transform_4, window_bounds = array<i64: 1, 24, 32>}, {transform_indices = @transform_5, window_bounds = array<i64: 1, 1, 24>}, {transform_indices = @transform_6, window_bounds = array<i64: 1, 8, 16>}, {transform_indices = @transform_7, window_bounds = array<i64: 1, 1, 8>}, {transform_indices = @transform_8, window_bounds = array<i64: 1, 8, 16>}, {transform_indices = @transform_9, window_bounds = array<i64: 1, 1, 8>}, {transform_indices = @transform_10, window_bounds = array<i64: 1, 128, 8>}, {pipeline_mode = #tpu.pipeline_mode<synchronous>, transform_indices = @transform_11, window_bounds = array<i64: 1, 128>}, {transform_indices = @transform_12, window_bounds = array<i64: 1, 1, 128>}]} {
    %c0_i32 = arith.constant 0 : i32
    %0 = arith.cmpi eq, %arg1, %c0_i32 : i32
    %1 = arith.extui %0 : i1 to i32
    %c0_i32_0 = arith.constant 0 : i32
    %2 = arith.cmpi ne, %1, %c0_i32_0 : i32
    scf.if %2 {
      %cst_49 = arith.constant 0.000000e+00 : f32
      %75 = vector.broadcast %cst_49 : f32 to vector<8x128xf32>
      %c0_50 = arith.constant 0 : index
      %c0_51 = arith.constant 0 : index
      %76 = vector.load %arg15[%c0_50, %c0_51] : memref<8x128xf32, #tpu.memory_space<vmem>>, vector<8x128xf32>
      tpu.vector_store %arg15[%c0_50, %c0_51], %75 {strides = array<i32>} : memref<8x128xf32, #tpu.memory_space<vmem>>, vector<8x128xf32>,
    } else {
    }
    %c0 = arith.constant 0 : index
    %c0_1 = arith.constant 0 : index
    %c0_2 = arith.constant 0 : index
    %3 = vector.load %arg2[%c0, %c0_1, %c0_2] : memref<1x8x32xbf16, #tpu.memory_space<vmem>>, vector<1x8x32xbf16>
    %4 = vector.shape_cast %3 : vector<1x8x32xbf16> to vector<8x32xbf16>
    %c0_3 = arith.constant 0 : index
    %c0_4 = arith.constant 0 : index
    %c0_5 = arith.constant 0 : index
    %5 = vector.load %arg4[%c0_3, %c0_4, %c0_5] : memref<1x8x16xbf16, #tpu.memory_space<vmem>>, vector<1x8x16xbf16>
    %6 = vector.shape_cast %5 : vector<1x8x16xbf16> to vector<8x16xbf16>
    %c0_6 = arith.constant 0 : index
    %c0_7 = arith.constant 0 : index
    %c0_8 = arith.constant 0 : index
    %7 = vector.load %arg3[%c0_6, %c0_7, %c0_8] : memref<1x1x16xbf16, #tpu.memory_space<vmem>>, vector<1x1x16xbf16>
    %8 = vector.shape_cast %7 : vector<1x1x16xbf16> to vector<1x16xbf16>
    %c0_9 = arith.constant 0 : index
    %c0_10 = arith.constant 0 : index
    %c0_11 = arith.constant 0 : index
    %9 = vector.load %arg5[%c0_9, %c0_10, %c0_11] : memref<1x1x8xf32, #tpu.memory_space<vmem>>, vector<1x1x8xf32>
    %10 = vector.shape_cast %9 : vector<1x1x8xf32> to vector<1x8xf32>
    %c0_12 = arith.constant 0 : index
    %c0_13 = arith.constant 0 : index
    %c0_14 = arith.constant 0 : index
    %11 = vector.load %arg6[%c0_12, %c0_13, %c0_14] : memref<1x24x32xbf16, #tpu.memory_space<vmem>>, vector<1x24x32xbf16>
    %12 = vector.shape_cast %11 : vector<1x24x32xbf16> to vector<24x32xbf16>
    %cst = arith.constant dense<0.000000e+00> : vector<8x24xf32>
    %13 = tpu.matmul %4, %12, %cst {dimension_numbers = #tpu.dot_dimension_numbers<[1], [1], [0], [0], [0, 0, 1, 0], [], []>} : vector<8x32xbf16>, vector<24x32xbf16>, vector<8x24xf32> -> vector<8x24xf32>
    %c0_15 = arith.constant 0 : index
    %c0_16 = arith.constant 0 : index
    %c0_17 = arith.constant 0 : index
    %14 = vector.load %arg7[%c0_15, %c0_16, %c0_17] : memref<1x1x24xf32, #tpu.memory_space<vmem>>, vector<1x1x24xf32>
    %15 = vector.shape_cast %14 : vector<1x1x24xf32> to vector<1x24xf32>
    %16 = vector.broadcast %15 : vector<1x24xf32> to vector<8x24xf32>
    %17 = arith.addf %13, %16 : vector<8x24xf32>
    %cst_18 = arith.constant 0.000000e+00 : f32
    %18 = vector.broadcast %cst_18 : f32 to vector<8x24xf32>
    %19 = arith.maximumf %17, %18 : vector<8x24xf32>
    %20 = vector.extract_strided_slice %19 {offsets = [0, 0], sizes = [8, 8], strides = [1, 1]} : vector<8x24xf32> to vector<8x8xf32>
    %21 = vector.extract_strided_slice %19 {offsets = [0, 8], sizes = [8, 8], strides = [1, 1]} : vector<8x24xf32> to vector<8x8xf32>
    %22 = vector.extract_strided_slice %19 {offsets = [0, 16], sizes = [8, 8], strides = [1, 1]} : vector<8x24xf32> to vector<8x8xf32>
    %23 = arith.truncf %22 : vector<8x8xf32> to vector<8x8xbf16>
    %c0_19 = arith.constant 0 : index
    %c0_20 = arith.constant 0 : index
    %c0_21 = arith.constant 0 : index
    %24 = vector.load %arg10[%c0_19, %c0_20, %c0_21] : memref<1x8x16xbf16, #tpu.memory_space<vmem>>, vector<1x8x16xbf16>
    %25 = vector.shape_cast %24 : vector<1x8x16xbf16> to vector<8x16xbf16>
    %cst_22 = arith.constant dense<0.000000e+00> : vector<8x8xf32>
    %26 = tpu.matmul %6, %25, %cst_22 {dimension_numbers = #tpu.dot_dimension_numbers<[1], [1], [0], [0], [0, 0, 1, 0], [], []>} : vector<8x16xbf16>, vector<8x16xbf16>, vector<8x8xf32> -> vector<8x8xf32>
    %c0_23 = arith.constant 0 : index
    %c0_24 = arith.constant 0 : index
    %c0_25 = arith.constant 0 : index
    %27 = vector.load %arg11[%c0_23, %c0_24, %c0_25] : memref<1x1x8xf32, #tpu.memory_space<vmem>>, vector<1x1x8xf32>
    %28 = vector.shape_cast %27 : vector<1x1x8xf32> to vector<1x8xf32>
    %29 = vector.broadcast %28 : vector<1x8xf32> to vector<8x8xf32>
    %30 = arith.addf %26, %29 : vector<8x8xf32>
    %cst_26 = arith.constant 0.000000e+00 : f32
    %31 = vector.broadcast %cst_26 : f32 to vector<8x8xf32>
    %32 = arith.maximumf %30, %31 : vector<8x8xf32>
    %c0_27 = arith.constant 0 : index
    %c0_28 = arith.constant 0 : index
    %c0_29 = arith.constant 0 : index
    %33 = vector.load %arg8[%c0_27, %c0_28, %c0_29] : memref<1x8x16xbf16, #tpu.memory_space<vmem>>, vector<1x8x16xbf16>
    %34 = vector.shape_cast %33 : vector<1x8x16xbf16> to vector<8x16xbf16>
    %cst_30 = arith.constant dense<0.000000e+00> : vector<1x8xf32>
    %35 = tpu.matmul %8, %34, %cst_30 {dimension_numbers = #tpu.dot_dimension_numbers<[1], [1], [0], [0], [0, 0, 1, 0], [], []>} : vector<1x16xbf16>, vector<8x16xbf16>, vector<1x8xf32> -> vector<1x8xf32>
    %c0_31 = arith.constant 0 : index
    %c0_32 = arith.constant 0 : index
    %c0_33 = arith.constant 0 : index
    %36 = vector.load %arg9[%c0_31, %c0_32, %c0_33] : memref<1x1x8xf32, #tpu.memory_space<vmem>>, vector<1x1x8xf32>
    %37 = vector.shape_cast %36 : vector<1x1x8xf32> to vector<1x8xf32>
    %38 = arith.addf %35, %37 : vector<1x8xf32>
    %cst_34 = arith.constant 0.000000e+00 : f32
    %39 = vector.broadcast %cst_34 : f32 to vector<1x8xf32>
    %40 = arith.maximumf %38, %39 : vector<1x8xf32>
    %41 = arith.mulf %40, %40 : vector<1x8xf32>
    %cst_35 = arith.constant dense<0.000000e+00> : vector<1xf32>
    %42 = vector.multi_reduction <add>, %41, %cst_35 [1] : vector<1x8xf32> to vector<1xf32>
    %43 = vector.shape_cast %42 : vector<1xf32> to vector<1x1xf32>
    %44 = tpu.concatenate %20, %32 in 1 : vector<8x8xf32>, vector<8x8xf32> -> vector<8x16xf32>
    %45 = arith.truncf %44 : vector<8x16xf32> to vector<8x16xbf16>
    %46 = tpu.concatenate %21, %32 in 1 : vector<8x8xf32>, vector<8x8xf32> -> vector<8x16xf32>
    %47 = arith.truncf %46 : vector<8x16xf32> to vector<8x16xbf16>
    %cst_36 = arith.constant dense<0.000000e+00> : vector<8x8xf32>
    %48 = tpu.matmul %45, %47, %cst_36 {dimension_numbers = #tpu.dot_dimension_numbers<[1], [1], [0], [0], [0, 0, 1, 0], [], []>} : vector<8x16xbf16>, vector<8x16xbf16>, vector<8x8xf32> -> vector<8x8xf32>
    %49 = vector.broadcast %43 : vector<1x1xf32> to vector<1x8xf32>
    %50 = arith.addf %10, %49 : vector<1x8xf32>
    %51 = vector.broadcast %50 : vector<1x8xf32> to vector<8x8xf32>
    %52 = arith.addf %48, %51 : vector<8x8xf32>
    %cst_37 = arith.constant dense<0xFF800000> : vector<8xf32>
    %53 = vector.multi_reduction <maximumf>, %52, %cst_37 [1] : vector<8x8xf32> to vector<8xf32>
    %54 = vector.shape_cast %53 : vector<8xf32> to vector<8x1xf32>
    %55 = vector.broadcast %54 : vector<8x1xf32> to vector<8x8xf32>
    %56 = arith.subf %52, %55 : vector<8x8xf32>
    %57 = math.exp %56 : vector<8x8xf32>
    %cst_38 = arith.constant dense<0.000000e+00> : vector<8xf32>
    %58 = vector.multi_reduction <add>, %57, %cst_38 [1] : vector<8x8xf32> to vector<8xf32>
    %59 = vector.shape_cast %58 : vector<8xf32> to vector<8x1xf32>
    %60 = arith.truncf %57 : vector<8x8xf32> to vector<8x8xbf16>
    %cst_39 = arith.constant dense<0.000000e+00> : vector<8x8xf32>
    %61 = tpu.matmul %60, %23, %cst_39 {dimension_numbers = #tpu.dot_dimension_numbers<[1], [0], [0], [1], [0, 0, 1, 1], [], []>} : vector<8x8xbf16>, vector<8x8xbf16>, vector<8x8xf32> -> vector<8x8xf32>
    %62 = tpu.reciprocal %59 {approx = true} : vector<8x1xf32> -> vector<8x1xf32>
    %63 = vector.broadcast %62 : vector<8x1xf32> to vector<8x8xf32>
    %64 = arith.mulf %61, %63 : vector<8x8xf32>
    %c0_40 = arith.constant 0 : index
    %c0_41 = arith.constant 0 : index
    %65 = vector.load %arg15[%c0_40, %c0_41] : memref<8x128xf32, #tpu.memory_space<vmem>>, vector<8x128xf32>
    %66 = arith.truncf %64 : vector<8x8xf32> to vector<8x8xbf16>
    %c0_42 = arith.constant 0 : index
    %c0_43 = arith.constant 0 : index
    %c0_44 = arith.constant 0 : index
    %67 = vector.load %arg12[%c0_42, %c0_43, %c0_44] : memref<1x128x8xbf16, #tpu.memory_space<vmem>>, vector<1x128x8xbf16>
    %68 = vector.shape_cast %67 : vector<1x128x8xbf16> to vector<128x8xbf16>
    %cst_45 = arith.constant dense<0.000000e+00> : vector<8x128xf32>
    %69 = tpu.matmul %66, %68, %cst_45 {dimension_numbers = #tpu.dot_dimension_numbers<[1], [1], [0], [0], [0, 0, 1, 0], [], []>} : vector<8x8xbf16>, vector<128x8xbf16>, vector<8x128xf32> -> vector<8x128xf32>
    %70 = arith.addf %65, %69 : vector<8x128xf32>
    %c0_46 = arith.constant 0 : index
    %c0_47 = arith.constant 0 : index
    %71 = vector.load %arg15[%c0_46, %c0_47] : memref<8x128xf32, #tpu.memory_space<vmem>>, vector<8x128xf32>
    tpu.vector_store %arg15[%c0_46, %c0_47], %70 {strides = array<i32>} : memref<8x128xf32, #tpu.memory_space<vmem>>, vector<8x128xf32>,
    %c3_i32 = arith.constant 3 : i32
    %72 = arith.cmpi eq, %arg1, %c3_i32 : i32
    %73 = arith.extui %72 : i1 to i32
    %c0_i32_48 = arith.constant 0 : i32
    %74 = arith.cmpi ne, %73, %c0_i32_48 : i32
    scf.if %74 {
      %c0_49 = arith.constant 0 : index
      %c0_50 = arith.constant 0 : index
      %75 = vector.load %arg15[%c0_49, %c0_50] : memref<8x128xf32, #tpu.memory_space<vmem>>, vector<8x128xf32>
      %c0_51 = arith.constant 0 : index
      %c0_52 = arith.constant 0 : index
      %76 = vector.load %arg13[%c0_51, %c0_52] : memref<1x128xf32, #tpu.memory_space<vmem>>, vector<1x128xf32>
      %77 = vector.broadcast %76 : vector<1x128xf32> to vector<8x128xf32>
      %78 = arith.addf %75, %77 : vector<8x128xf32>
      %cst_53 = arith.constant 0.000000e+00 : f32
      %79 = vector.broadcast %cst_53 : f32 to vector<8x128xf32>
      %80 = arith.maximumf %78, %79 : vector<8x128xf32>
      %cst_54 = arith.constant dense<0.000000e+00> : vector<128xf32>
      %81 = vector.multi_reduction <add>, %80, %cst_54 [0] : vector<8x128xf32> to vector<128xf32>
      %82 = vector.shape_cast %81 : vector<128xf32> to vector<1x128xf32>
      %c0_55 = arith.constant 0 : index
      %c0_56 = arith.constant 0 : index
      %c0_57 = arith.constant 0 : index
      %83 = vector.load %arg14[%c0_55, %c0_56, %c0_57] : memref<1x1x128xf32, #tpu.memory_space<vmem>>, vector<1x1x128xf32>
      %84 = vector.shape_cast %83 : vector<1x1x128xf32> to vector<1x128xf32>
      %85 = vector.shape_cast %82 : vector<1x128xf32> to vector<1x1x128xf32>
      tpu.vector_store %arg14[%c0_55, %c0_56, %c0_57], %85 {strides = array<i32>} : memref<1x1x128xf32, #tpu.memory_space<vmem>>, vector<1x1x128xf32>,
    } else {
    }
    return
  }
  func.func @transform_0(%arg0: i32, %arg1: i32) -> (i32, i32, i32) {
    %c0_i32 = arith.constant 0 : i32
    %c0_i32_0 = arith.constant 0 : i32
    %c0_i32_1 = arith.constant 0 : i32
    return %arg0, %c0_i32, %c0_i32_0 : i32, i32, i32
  }
  func.func @transform_1(%arg0: i32, %arg1: i32) -> (i32, i32, i32) {
    %c0_i32 = arith.constant 0 : i32
    %c0_i32_0 = arith.constant 0 : i32
    %c0_i32_1 = arith.constant 0 : i32
    return %arg0, %c0_i32, %c0_i32_0 : i32, i32, i32
  }
  func.func @transform_2(%arg0: i32, %arg1: i32) -> (i32, i32, i32) {
    %c0_i32 = arith.constant 0 : i32
    %c0_i32_0 = arith.constant 0 : i32
    %c0_i32_1 = arith.constant 0 : i32
    return %arg0, %c0_i32, %c0_i32_0 : i32, i32, i32
  }
  func.func @transform_3(%arg0: i32, %arg1: i32) -> (i32, i32, i32) {
    %c4_i32 = arith.constant 4 : i32
    %0 = arith.muli %arg0, %c4_i32 : i32
    %1 = arith.addi %0, %arg1 : i32
    %c0_i32 = arith.constant 0 : i32
    %c0_i32_0 = arith.constant 0 : i32
    %c0_i32_1 = arith.constant 0 : i32
    return %1, %c0_i32, %c0_i32_0 : i32, i32, i32
  }
  func.func @transform_4(%arg0: i32, %arg1: i32) -> (i32, i32, i32) {
    %c0_i32 = arith.constant 0 : i32
    %c0_i32_0 = arith.constant 0 : i32
    %c0_i32_1 = arith.constant 0 : i32
    return %arg1, %c0_i32, %c0_i32_0 : i32, i32, i32
  }
  func.func @transform_5(%arg0: i32, %arg1: i32) -> (i32, i32, i32) {
    %c0_i32 = arith.constant 0 : i32
    %c0_i32_0 = arith.constant 0 : i32
    %c0_i32_1 = arith.constant 0 : i32
    return %arg1, %c0_i32, %c0_i32_0 : i32, i32, i32
  }
  func.func @transform_6(%arg0: i32, %arg1: i32) -> (i32, i32, i32) {
    %c0_i32 = arith.constant 0 : i32
    %c0_i32_0 = arith.constant 0 : i32
    %c0_i32_1 = arith.constant 0 : i32
    return %arg1, %c0_i32, %c0_i32_0 : i32, i32, i32
  }
  func.func @transform_7(%arg0: i32, %arg1: i32) -> (i32, i32, i32) {
    %c0_i32 = arith.constant 0 : i32
    %c0_i32_0 = arith.constant 0 : i32
    %c0_i32_1 = arith.constant 0 : i32
    return %arg1, %c0_i32, %c0_i32_0 : i32, i32, i32
  }
  func.func @transform_8(%arg0: i32, %arg1: i32) -> (i32, i32, i32) {
    %c0_i32 = arith.constant 0 : i32
    %c0_i32_0 = arith.constant 0 : i32
    %c0_i32_1 = arith.constant 0 : i32
    return %arg1, %c0_i32, %c0_i32_0 : i32, i32, i32
  }
  func.func @transform_9(%arg0: i32, %arg1: i32) -> (i32, i32, i32) {
    %c0_i32 = arith.constant 0 : i32
    %c0_i32_0 = arith.constant 0 : i32
    %c0_i32_1 = arith.constant 0 : i32
    return %arg1, %c0_i32, %c0_i32_0 : i32, i32, i32
  }
  func.func @transform_10(%arg0: i32, %arg1: i32) -> (i32, i32, i32) {
    %c0_i32 = arith.constant 0 : i32
    %c0_i32_0 = arith.constant 0 : i32
    %c0_i32_1 = arith.constant 0 : i32
    return %arg1, %c0_i32, %c0_i32_0 : i32, i32, i32
  }
  func.func @transform_11(%arg0: i32, %arg1: i32) -> (i32, i32) {
    %c0_i32 = arith.constant 0 : i32
    %c0_i32_0 = arith.constant 0 : i32
    %c0_i32_1 = arith.constant 0 : i32
    return %c0_i32, %c0_i32_0 : i32, i32
  }
  func.func @transform_12(%arg0: i32, %arg1: i32) -> (i32, i32, i32) {
    %c0_i32 = arith.constant 0 : i32
    %c0_i32_0 = arith.constant 0 : i32
    %c0_i32_1 = arith.constant 0 : i32
    return %arg0, %c0_i32, %c0_i32_0 : i32, i32, i32
  }
}

</mosaic_0001>

<bundles_post_ra>
// kernel: tpu_custom_call.1
= control target key start
LH: loop header
LB: loop body
LE: loop exit
PB: predicated region body
PF: predicated region fallthrough
CT: control target
= control target key end

     0   :  { %s1898_s0 = inlined_call_operand.vmem [shape: bf16[2,8,32], index: 0, kind: input, shape index: {}]   ;;  %s1899_s1 = inlined_call_operand.vmem [shape: bf16[2,1,16], index: 1, kind: input, shape index: {}]   ;;  %s1900_s2 = inlined_call_operand.vmem [shape: bf16[2,8,16], index: 2, kind: input, shape index: {}]   ;;  %s1901_s3 = inlined_call_operand.vmem [shape: f32[8,1,8], index: 3, kind: input, shape index: {}]   ;;  %s1902_s4 = inlined_call_operand.vmem [shape: bf16[4,24,32], index: 4, kind: input, shape index: {}]   ;;  %s1903_s5 = inlined_call_operand.vmem [shape: f32[4,1,24], index: 5, kind: input, shape index: {}]   ;;  %s1904_s6 = inlined_call_operand.vmem [shape: bf16[4,8,16], index: 6, kind: input, shape index: {}]   ;;  %s1905_s7 = inlined_call_operand.vmem [shape: f32[4,1,8], index: 7, kind: input, shape index: {}]   ;;  %s1906_s8 = inlined_call_operand.vmem [shape: bf16[4,8,16], index: 8, kind: input, shape index: {}]   ;;  %s1907_s9 = inlined_call_operand.vmem [shape: f32[4,1,8], index: 9, kind: input, shape index: {}]   ;;  %s1908_s10 = inlined_call_operand.vmem [shape: bf16[4,128,8], index: 10, kind: input, shape index: {}]   ;;  %s1909_s11 = inlined_call_operand.vmem [shape: f32[1,128], index: 11, kind: input, shape index: {}]   ;;  %s1910_s12 = inlined_call_operand.hbm [shape: f32[2,1,128], index: 12, kind: output, shape index: {}]  }
   0x1   :  { %1924 = sst [smem:[#allocation18_spill]] %s1898_s0 }
   0x2   :  { %1925 = sst [smem:[#allocation19_spill]] %s1899_s1 }
   0x3   :  { %1926 = sst [smem:[#allocation20_spill]] %s1900_s2 }
   0x4   :  { %1927 = sst [smem:[#allocation21_spill]] %s1901_s3 }
   0x5   :  { %1928 = sst [smem:[#allocation22_spill]] %s1909_s11 }
   0x6   :  { %1929 = sst [smem:[#allocation23_spill]] %s1910_s12 }
   0x7   :  { %17 = vsyncpa [#allocation4], 0 }
   0x8   :  { %19 = vsyncpa [#allocation4 + $0x1], 0  ;;  %s1617_s21 = smov 0   ;;  %s1619_s22 = smov 0  }
   0x9   :  { %s1621_s23 = smov 0   ;;  %s1623_s24 = smov 0  }
   0xa   :  { %s1625_s25 = smov 0   ;;  %s1627_s26 = smov 0  }
   0xb   :  { %s1629_s27 = smov 0   ;;  %s1631_s28 = smov 0  }
   0xc LB: > { %1930 = sst [smem:[#allocation6_spill]] %s1515_s21  ;;  %s1245_s29 = sadd.s32 4294967295, %s1543_s28   ;;  %s1543_s28 = sphi %s1631_s28, %s25_s28   ;;  %s1539_s27 = sphi %s1629_s27, %s1969_s27   ;;  %s1535_s26 = sphi %s1627_s26, %s1968_s26   ;;  %s1531_s25 = sphi %s1625_s25, %s1967_s25   ;;  %s1527_s24 = sphi %s1623_s24, %s1966_s24   ;;  %s1523_s23 = sphi %s1621_s23, %s1972_s23   ;;  %s1519_s22 = sphi %s1619_s22, %s1971_s22   ;;  %s1515_s21 = sphi %s1617_s21, %s1970_s21  }
   0xd   : > { %1931 = sst [smem:[#allocation7_spill]] %s1523_s23  ;;  %s1246_s30 = sadd.s32 4294967294, %s1543_s28  }
   0xe   : > { %1932 = sst [smem:[#allocation8_spill]] %s1531_s25  ;;  %s34_s13 = sadd.s32 1, %s1535_s26 }
   0xf   : > { %1933 = sst [smem:[#allocation9_spill]] %s1535_s26  ;;  %p35_p0 = scmp.ge.s32.totalorder %s34_s13, 4 }
  0x10   : > { %1934 = sst [smem:[#allocation10_spill]] %s1539_s27  ;;  %s37_s14 = sadd.s32 1, %s1539_s27 }
  0x11   : > { %1935 = sst [smem:[#allocation11_spill]] %s1543_s28  ;;  %p365_p1 = scmp.ne.s32.totalorder %s1523_s23, %s1519_s22 }
  0x12   : > { %p366_p2 = scmp.eq.s32.totalorder %s1245_s29, 7  ;;  %s1974_s13 = smov (%p35_p0, %s34_s13), 0 }
  0x13   : > { %1936 = sst [smem:[#allocation12_spill]] %s1974_s13  ;;  %s1976_s14 = smov (!%p35_p0, %s37_s14), %s1539_s27 }
  0x14   : > { %p1666_p3 = por %p366_p2, %p365_p1  ;;  %p371_p4 = scmp.ne.s32.totalorder %s1519_s22, %s1515_s21 }
  0x15   : > { %p39_p5 = scmp.ge.s32.totalorder %s1976_s14, 2  ;;  %p372_p6 = scmp.eq.s32.totalorder %s1246_s30, 7 }
  0x16   : > { %s1937_s15 = scalar_select %p1666_p3, 1, 0 }
  0x17   : > { %p1251_p7 = scmp.ge.s32.totalorder %s1543_s28, 1  ;;  %p471_p8 = scmp.lt.s32.totalorder %s1543_s28, 9 }
  0x18   : > { %1938 = sst [smem:[#allocation13_spill]] %s1937_s15  ;;  %s1978_s14 = smov (%p39_p5, %s1976_s14), 0 }
  0x19   : > { %1939 = sst [smem:[#allocation14_spill]] %s1978_s14  ;;  %p1676_p9 = por %p372_p6, %p371_p4 }
  0x1a   : > { %p472_p10 = pnand %p1251_p7, %p471_p8  ;;  %s352_s17 = ssub.s32 %s1539_s27, %s1978_s14 }
  0x1b   : > { %s1940_s16 = scalar_select %p1676_p9, 1, 0 }
  0x1c   : > { %s355_s18 = sadd.s32 1, %s1523_s23  ;;  %p353_p11 = scmp.eq.s32.totalorder %s352_s17, 0 }
  0x1d   : > { %1941 = sst [smem:[#allocation15_spill]] %s1940_s16  ;;  %475 = sbr.rel (%p472_p10) target bundleno = 1286 (0x506), region = 68 }
  0x1e   : > { %s1684_s19 = scalar_select %p353_p11, %s1523_s23, %s355_s18  }
  0x20   : > { %1942 = sst [smem:[#allocation16_spill]] %s1684_s19 }
  0x24   : > { %p550_p12 = scmp.lt.s32.totalorder %s1531_s25, 1  ;;  %s1254_s29 = sshll.u32 %s1531_s25, 2 }
  0x25   : > { %s562_s14 = sadd.s32 %s1527_s24, %s1254_s29  ;;  %p568_p13 = scmp.lt.s32.totalorder %s1527_s24, 3 }
  0x26   : > { %s1690_s30 = scalar_select %p550_p12, %s1531_s25, 1 }
  0x27   : > { %s1945_s0 = sld [smem:[#allocation18_spill]]  ;;  %s1946_s2 = sld [smem:[#allocation20_spill]] }
  0x28   : > { %1943 = sst [smem:[#allocation17_spill]] %s1690_s30  ;;  %s1252_s17 = sshll.u32 %s1690_s30, 2 }
  0x29   : > { %p563_p0 = scmp.lt.s32.totalorder %s562_s14, 7  ;;  %s1948_s12 = sand.u32 1, %s1519_s22  }
  0x2a   : > { %s1710_s28 = scalar_select %p568_p13, %s1527_s24, 3 }
  0x2b   : > { %s1980_s14 = smov (!%p563_p0, %s562_s14), 7  ;;  %s1751_s15 = scalar_lea.vmem [#allocation3], %s1948_s12 }
  0x2c   : > { %s1357_s26 = smul.u32 12, %s1710_s28  ;;  %s1256_s18 = sshll.u32 %s1710_s28, 2 }
  0x2d   : > { %s1702_s23 = scalar_lea.vmem %s1945_s0, %s1252_s17  ;;  %s1707_s21 = scalar_lea.vmem %s1946_s2, %s1252_s17 }
  0x2e   : > { %s572_s2 = scalar_lea.vmem %s1902_s4, %s1357_s26  ;;  %s1730_s25 = scalar_lea.vmem %s1904_s6, %s1256_s18 }
  0x2f   : > { %s582_s30 = scalar_lea.vmem %s1905_s7, %s1710_s28  ;;  %s586_s16 = scalar_lea.vmem %s1906_s8, %s1256_s18 }
  0x30   : > { %s589_s17 = scalar_lea.vmem %s1907_s9, %s1710_s28  ;;  %s1284_s3 = sshll.u32 %s1710_s28, 6 }
  0x31   : > { %s1747_s26 = scalar_lea.vmem %s1908_s10, %s1284_s3  ;;  %p1260_p1 = scmp.ne.s32.totalorder %s1527_s24, 0 }
  0x32   : > { %v1545_v0 = vmov (!%p1260_p1), 0.0  }
  0x33   : > { %599 = sbr.rel (%p1260_p1) target bundleno = 58 (0x3a), region = 72  ;;  %600 = vst [vmem:[#allocation2] sm:$0xff] (!%p1260_p1), %v1545_v0 }
  0x3a PF: > { %v1435_v1 = vld [vmem:[%s572_s2] sm:$0xff]   ;;  %v1546_v2 = vmov 0.0   ;;  %vm623_vm0 = vcmask 261120   ;;  %v1436_v3 = vld [vmem:[%s572_s2 + $0x8] ss:$0 sps:$4 sm:$0xff]   ;;  %vm1547_vm1 = vmmov 0   ;;  %s1952_s13 = scalar_lea.vmem %s1903_s5, %s1710_s28  ;;  %v800_v46 = vlaneseq }
  0x3b   : > { %1305 = vmatprep.subr.bf16.mxu1 %v1546_v2  ;;  %1337 = vmatprep.subr.bf16.mxu0 %v1546_v2  ;;  %v628_v4 = vsel %vm623_vm0, %v1435_v1, 0  ;;  %v631_v5 = vsel %vm623_vm0, %v1436_v3, 0  ;;  %s1949_s1 = sld [smem:[#allocation17_spill]]  ;;  %v675_v6 = vld [vmem:[%s586_s16] sm:$0xf]  ;;  %vm683_vm2 = vcmask 130048  }
  0x3c   : > { %1309 = vmatprep.mubr.msk.bf16.mxu1 %vm1547_vm1, %v1546_v2  ;;  %1353 = vmatprep.mubr.msk.bf16.mxu0 %vm1547_vm1, %v1546_v2  ;;  %v601_v7 = vld [vmem:[%s1702_s23] sm:$0xf]  ;;  %v688_v8 = vsel %vm683_vm2, %v675_v6, 0  ;;  %s1950_s11 = sld [smem:[#allocation19_spill]]  ;;  %s1548_s19 = smov 8   ;;  %vm781_vm3 = vcmask 57344  }
  0x3d   : > { %1306 = vmatpush3.bf16.xpose.msra.mxu1 %v628_v4  ;;  %v731_v9 = vld [vmem:[%s1730_s25] sm:$0xf]  ;;  %s1550_s0 = smov 112   ;;  %vm789_vm4 = vcmask 64512   ;;  %vm867_vm5 = vcmask 1043456   ;;  %v801_v47 = vshrl.u32 %v800_v46, 7 }
  0x3e   : > { %1307 = vmatprep.subr.bf16.mxu1 %v1546_v2  ;;  %v602_v10 = vld [vmem:[%s1707_s21] sm:$0xf]  ;;  %v737_v11 = vsel %vm683_vm2, %v731_v9, 0  ;;  %s1953_s27 = sld [smem:[#allocation21_spill]]  ;;  %v1438_v4 = vld [vmem:[%s1747_s26 + $0x8] sm:$0xff]   ;;  %v1439_v6 = vld [vmem:[%s1747_s26 + $0x10] sm:$0xff]  }
  0x3f   : > { %v1265_v17 = vld [vmem:[%s589_s17] ss:$0 sm:$0xff]  ;;  %s1549_s17 = smov 120   ;;  %v802_v51 = vsub.s32 0, %v801_v47  ;;  %p1279_p2 = scmp.ne.s32.totalorder %s1527_s24, 3 }
  0x40   : > { %v1261_v18 = vld [vmem:[%s1952_s13] ss:$0 sm:$0xff] }
  0x41   : > { %v732_v27 = vld [vmem:[%s582_s30] sm:$0x1] }
  0x42   : > { %s1951_s23 = scalar_lea.vmem %s1950_s11, %s1949_s1  ;;  %v1437_v1 = vld [vmem:[%s1747_s26] sm:$0xff]   ;;  %s1955_s1 = sld [smem:[#allocation22_spill]] (!%p1279_p2) }
  0x43   : > { %v603_v12 = vld [vmem:[%s1951_s23] sm:$0x1]  ;;  %v975_v3 = vsel %vm789_vm4, %v1437_v1, 0 }
  0x44   : > { %s1954_s12 = scalar_lea.vmem %s1953_s27, %s1980_s14  ;;  %1338 = vmatpush3.bf16.xpose.msra.mxu0 %v975_v3 }
  0x45   : > { %1308 = vmatpush3.bf16.xpose.msra.mxu1 %v631_v5  ;;  %v604_v48 = vld [vmem:[%s1954_s12] sm:$0x1]  ;;  %1339 = vmatprep.subr.bf16.mxu0 %v1546_v2  ;;  %v978_v5 = vsel %vm789_vm4, %v1438_v4, 0 }
  0x46   : > { %1313 = vmatprep.subr.bf16.mxu1 %v1546_v2 }
  0x4c   : > { %1310 = vmatmul.mubr.msk.bf16.vlgmr.msra.gmra.mrb[0].mxu1 %vm623_vm0, %v601_v7  ;;  %1340 = vmatpush3.bf16.xpose.msra.mxu0 %v978_v5  ;;  %v981_v7 = vsel %vm789_vm4, %v1439_v6, 0 }
  0x4d   : > { %1314 = vmatpush3.bf16.xpose.msra.mxu1 %v688_v8  ;;  %1315 = vmatprep.mubr.msk.bf16.mxu1 %vm1547_vm1, %v1546_v2  ;;  %v1440_v8 = vld [vmem:[%s1747_s26 + $0x18] sm:$0xff]  }
  0x4e   : > { %1319 = vmatprep.subr.bf16.mxu1 %v1546_v2  ;;  %1341 = vmatprep.subr.bf16.mxu0 %v1546_v2  ;;  %v984_v9 = vsel %vm789_vm4, %v1440_v8, 0 }
  0x54   : > { %1316 = vmatmul.mubr.msk.bf16.vlgmr.msra.gmra.mrb[4].mxu1 %vm683_vm2, %v602_v10  ;;  %1342 = vmatpush3.bf16.xpose.msra.mxu0 %v981_v7  ;;  %v1441_v10 = vld [vmem:[%s1747_s26 + $0x20] sm:$0xff]  }
  0x55   : > { %1320 = vmatpush3.bf16.xpose.msra.mxu1 %v737_v11  ;;  %1321 = vmatprep.mubr.msk.bf16.mxu1 %vm1547_vm1, %v1546_v2  ;;  %v987_v11 = vsel %vm789_vm4, %v1441_v10, 0 }
  0x56   : > { %1325 = vmatprep.subr.bf16.mxu1 %v1546_v2  ;;  %1343 = vmatprep.subr.bf16.mxu0 %v1546_v2 }
  0x5c   : > { %1322 = vmatmul.mubr.msk.bf16.vlgmr.msra.gmra.mrb[8].mxu1 %vm683_vm2, %v603_v12  ;;  %1344 = vmatpush3.bf16.xpose.msra.mxu0 %v984_v9  ;;  %v1442_v12 = vld [vmem:[%s1747_s26 + $0x28] sm:$0xff]  }
  0x5d   : > { %1327 = vmatprep.mubr.msk.bf16.mxu1 %vm1547_vm1, %v1546_v2  ;;  %1345 = vmatprep.subr.bf16.mxu0 %v1546_v2 }
  0x64   : > { %1346 = vmatpush3.bf16.xpose.msra.mxu0 %v987_v11 }
  0x65   : > { %1347 = vmatprep.subr.bf16.mxu0 %v1546_v2 }
 0x11f   : > { %v667_v13 = vpop.f32.mrb[0].mxu1 }
 0x120   : > { %v1311_v14 = vpop.f32.mrb[1].mxu1  ;;  %v668_v23 = vadd.f32 %v1261_v18, %v667_v13  ;;  %v990_v13 = vsel %vm789_vm4, %v1442_v12, 0 }
 0x121   : > { %v670_v15 = vpop.f32.mrb[2].mxu1  ;;  %1348 = vmatpush3.bf16.xpose.msra.mxu0 %v990_v13  ;;  %v1443_v14 = vld [vmem:[%s1747_s26 + $0x30] sm:$0xff]  }
 0x122   : > { %v1312_v16 = vpop.f32.mrb[3].mxu1  ;;  %v673_v26 = vmax.f32 %v668_v23, 0.0  ;;  %1349 = vmatprep.subr.bf16.mxu0 %v1546_v2  ;;  %v993_v15 = vsel %vm789_vm4, %v1443_v14, 0 }
 0x123   : > { %v1444_v16 = vld [vmem:[%s1747_s26 + $0x38] sm:$0xff]  }
 0x124   : > { %v674_v32 = vpack.c.bf16 %v673_v26, %v673_v26 }
 0x127   : > { %v724_v19 = vpop.f32.mrb[4].mxu1 }
 0x128   : > { %v725_v20 = vadd.f32 %v1265_v17, %v724_v19  ;;  %v1317_v21 = vpop.f32.mrb[5].mxu1  ;;  %v996_v17 = vsel %vm789_vm4, %v1444_v16, 0 }
 0x129   : > { %v727_v22 = vpop.f32.mrb[6].mxu1  ;;  %1350 = vmatpush3.bf16.xpose.msra.mxu0 %v993_v15 }
 0x12a   : > { %v730_v24 = vmax.f32 %v725_v20, 0.0  ;;  %v1318_v25 = vpop.f32.mrb[7].mxu1  ;;  %1351 = vmatprep.subr.bf16.mxu0 %v1546_v2 }
 0x12c   : > { %786 = vrot.lane.b32.xlu0 %v730_v24, %s1548_s19 }
 0x12f   : > { %v773_v28 = vpop.f32.mrb[8].mxu1 }
 0x130   : > { %793 = vrot.lane.b32.xlu0 %v673_v26, %s1549_s17  ;;  %v774_v29 = vadd.f32 %v773_v28, %v732_v27  ;;  %v1323_v30 = vpop.f32.mrb[9].mxu1 }
 0x131   : > { %v776_v31 = vpop.f32.mrb[10].mxu1  ;;  %1352 = vmatpush3.bf16.xpose.msra.mxu0 %v996_v17 }
 0x132   : > { %v779_v33 = vmax.f32 %v774_v29, 0.0  ;;  %v1324_v34 = vpop.f32.mrb[11].mxu1 }
 0x134   : > { %862 = vrot.lane.b32.xlu0 %v674_v32, %s1550_s0  ;;  %v780_v35 = vmul.f32 %v779_v33, %v779_v33  ;;  %v1280_v32 = vld [vmem:[%s1955_s1] ss:$0 sm:$0xff] (!%p1279_p2) }
 0x136   : > { %v782_v36 = vsel %vm781_vm3, %v780_v35, 0.0 }
 0x137   : > { %783 = vadd.xlane.f32.xlu1 %v782_v36 }
 0x19e   : > { %v787_v37 = vpop.permute.xlu0 %786 }
 0x19f   : > { %v790_v42 = vsel %vm789_vm4, %v673_v26, %v787_v37  ;;  %v913_v26 = vld [vmem:[#allocation2] sm:$0xff] }
 0x1a0   : > { %v791_v44 = vpack.c.bf16 %v790_v42, %v790_v42 }
 0x1a2   : > { %v794_v38 = vpop.permute.xlu0 %793 }
 0x1a3   : > { %v796_v39 = vsel %vm789_vm4, %v794_v38, %v787_v37 }
 0x1a4   : > { %v797_v40 = vpack.c.bf16 %v796_v39, %v796_v39 }
 0x1a6   : > { %v809_v41 = vsel %vm683_vm2, %v797_v40, 0  ;;  %v863_v43 = vpop.permute.xlu0 %862 }
 0x1a7   : > { %1326 = vmatpush3.bf16.xpose.msra.mxu1 %v809_v41  ;;  %v869_v45 = vsel %vm867_vm5, %v863_v43, 0 }
 0x1a8   : > { %1331 = vmatprep.subr.bf16.mxu1 %v1546_v2 }
 0x1ae   : > { %1328 = vmatmul.mubr.msk.bf16.vlgmr.msra.gmra.mrb[12].mxu1 %vm683_vm2, %v791_v44 }
 0x1af   : > { %1332 = vmatpush3.bf16.msra.mxu1 %v869_v45  ;;  %1333 = vmatprep.mubr.msk.bf16.mxu1 %vm1547_vm1, %v1546_v2 }
 0x1c4   : > { %v784_v49 = vpop.xlane.xlu1 %783 }
 0x1c5   : > { %v798_v50 = vadd.f32 %v784_v49, %v604_v48 }
 0x1c7   : > { %v803_v52 = vrot.slane %v798_v50, %v802_v51 }
 0x281   : > { %v845_v53 = vpop.f32.mrb[12].mxu1 }
 0x282   : > { %v846_v54 = vadd.f32 %v845_v53, %v803_v52  ;;  %v1329_v55 = vpop.f32.mrb[13].mxu1 }
 0x283   : > { %v848_v56 = vpop.f32.mrb[14].mxu1 }
 0x284   : > { %v1330_v57 = vpop.f32.mrb[15].mxu1  ;;  %v851_v58 = vsel %vm789_vm4, %v846_v54, -inf }
 0x285   : > { %852 = vmax.xlane.f32.xlu1 %v851_v58 }
 0x312   : > { %v853_v59 = vpop.xlane.xlu1 %852 }
 0x313   : > { %v854_v60 = vsub.f32 %v846_v54, %v853_v59 }
 0x315   : > { %v855_v61 = vmul.f32 1.442695, %v854_v60 }
 0x317   : > { %1445 = vpow2.f32 %v855_v61 }
 0x321   : > { %v1446_v62 = vpop.eup %1445 }
 0x322   : > { %v857_v63 = vsel %vm789_vm4, %v1446_v62, 0.0  ;;  %v860_v0 = vpack.c.bf16 %v1446_v62, %v1446_v62 }
 0x323   : > { %858 = vadd.xlane.f32.xlu1 %v857_v63 }
 0x324   : > { %1334 = vmatmul.mubr.msk.bf16.vlgmr.msra.gmra.mrb[16].mxu1 %vm789_vm4, %v860_v0 }
 0x3b0   : > { %v859_v18 = vpop.xlane.xlu1 %858 }
 0x3b1   : > { %1447 = vrcp.f32 %v859_v18 }
 0x3bb   : > { %v1448_v19 = vpop.eup %1447 }
 0x3f7   : > { %v905_v20 = vpop.f32.mrb[16].mxu1 }
 0x3f8   : > { %v912_v21 = vmul.f32 %v1448_v19, %v905_v20  ;;  %v1335_v22 = vpop.f32.mrb[17].mxu1 }
 0x3f9   : > { %v908_v23 = vpop.f32.mrb[18].mxu1 }
 0x3fa   : > { %v914_v24 = vpack.c.bf16 %v912_v21, %v912_v21  ;;  %v1336_v25 = vpop.f32.mrb[19].mxu1 }
 0x3fc   : > { %1354 = vmatmul.mubr.msk.bf16.vlgmr.msra.gmra.mrb[0].mxu0 %vm789_vm4, %v914_v24 }
 0x4cc   : > { %1043 = sbr.rel (%p1279_p2) target bundleno = 1259 (0x4eb), region = 76 }
 0x4cf   : > { %v1032_v27 = vpop.f32.mrb[0].mxu0 }
 0x4d0   : > { %v1038_v28 = vadd.f32 %v1032_v27, %v913_v26  ;;  %v1355_v29 = vpop.f32.mrb[1].mxu0 }
 0x4d1   : > { %v1035_v2 = vpop.f32.mrb[2].mxu0 }
 0x4d2   : > { %1039 = vst [vmem:[#allocation2] sm:$0xff] %v1038_v28  ;;  %v1356_v30 = vpop.f32.mrb[3].mxu0 }
 0x4d9   : > { %v1044_v31 = vld [vmem:[#allocation2] sm:$0xff] }
 0x4da   : > { %v1052_v33 = vadd.f32 %v1280_v32, %v1044_v31 }
 0x4dc   : > { %v1053_v34 = vmax.f32 %v1052_v33, 0.0 }
 0x4de   : > { %v1054_v35 = vrot.slane %v1053_v34, 4 }
 0x4e0   : > { %v1055_v36 = vadd.f32 %v1054_v35, %v1053_v34 }
 0x4e2   : > { %v1056_v37 = vrot.slane %v1055_v36, 2 }
 0x4e4   : > { %v1057_v38 = vadd.f32 %v1056_v37, %v1055_v36 }
 0x4e6   : > { %v1058_v39 = vrot.slane %v1057_v38, 1 }
 0x4e8   : > { %v1059_v40 = vadd.f32 %v1058_v39, %v1057_v38 }
 0x4ea   : > { %1060 = vst [vmem:[%s1751_s15] sm:$0x1] %v1059_v40 }
 0x4eb PF: > { %s1956_s2 = sld [smem:[#allocation8_spill]]  ;;  %s1074_s18 = sshll.u32 %s1751_s15, 4  ;;  %s1075_s18 = int_to_ptr.vmem [resolvable:$true] %s1074_s18 }
 0x4ec   : > { %s1958_s21 = sld [smem:[#allocation23_spill]]  ;;  %s1960_s13 = sand.u32 1, %s1519_s22  }
 0x4ed   : > { %s1062_s19 = scalar_lea.sflag [#allocation4], %s1960_s13  ;;  %s1449_s20 = scalar_lea.vmem %s1075_s18, 16 }
 0x4ee   : > { %p1450_p4 = scmp.ne.s32.totalorder %s1075_s18, %s1449_s20  ;;  %s1551_s29 = smov [#allocation3]  }
 0x4ef   : > { %s1453_s17 = sshll.u32 %s1551_s29, 4  ;;  %s1454_s17 = int_to_ptr.vmem [resolvable:$false] %s1453_s17 }
 0x4f0   : > { %p1451_p5 = pnand %p1450_p4, %p1666_p3  ;;  %s1455_s0 = scalar_lea.vmem %s1454_s17, 32 }
 0x4f1   : > { %s1281_s3 = sshll.u32 %s1956_s2, 4  ;;  %p1456_p7 = scmp.lt.s32.totalorder %s1075_s18, %s1454_s17 }
 0x4f2   : > { %s1959_s16 = smov %s1958_s21  ;;  %s1848_s25 = scalar_lea.hbm %s1958_s21, %s1281_s3 }
 0x4f3   : > { %p1452_p6 = pneg %p1451_p5  ;;  %p1457_p8 = scmp.lt.s32.totalorder %s1455_s0, %s1449_s20 }
 0x4f5   : > { %p1458_p10 = por %p1457_p8, %p1456_p7 }
 0x4f7   : > { %p1459_p11 = pnand %p1458_p10, %p1452_p6 }
 0x4f9   : > { %1462 = shalt.err (!%p1459_p11)
}
 0x4fa   : > { %s1463_s15 = scalar_lea.hbm %s1848_s25, 16  ;;  %s1467_s27 = scalar_lea.hbm %s1959_s16, 32 }
 0x4fb   : > { %p1464_p12 = scmp.ne.s32.totalorder %s1848_s25, %s1463_s15  ;;  %p1468_p1 = scmp.lt.u32.totalorder %s1848_s25, %s1959_s16 }
 0x4fc   : > { %p1469_p2 = scmp.lt.u32.totalorder %s1467_s27, %s1463_s15  ;;  %p1471_p5 = scmp.lt.u32.totalorder %s1463_s15, %s1848_s25 }
 0x4fd   : > { %p1465_p13 = pnand %p1464_p12, %p1666_p3 }
 0x4fe   : > { %p1470_p4 = por %p1469_p2, %p1468_p1 }
 0x4ff   : > { %p1466_p0 = pneg %p1465_p13 }
 0x500   : > { %p1472_p6 = por %p1471_p5, %p1470_p4 }
 0x502   : > { %p1473_p7 = pnand %p1472_p6, %p1466_p0 }
 0x504   : > { %1476 = shalt.err (!%p1473_p7)
}
 0x505   : > { %1358 = dma.vmem_to_hbm [thread:$0]  (%p1666_p3), %s1075_s18, 16, %s1848_s25, %s1062_s19  }
 0x506 PF: > { %s1961_s26 = sld [smem:[#allocation11_spill]]  ;;  %s1962_s1 = sld [smem:[#allocation6_spill]] }
 0x50c   : > { %p1364_p8 = scmp.ge.s32.totalorder %s1961_s26, 2  ;;  %s1086_s3 = sand.u32 1, %s1962_s1  }
 0x50d   : > { %s1087_s11 = scalar_lea.sflag [#allocation4], %s1086_s3 }
 0x50e   : > { %p1361_p10 = pnand %p1364_p8, %p1676_p9 }
 0x510   : > { %1510 = dma.done.wait (!%p1361_p10), %s1087_s11, 16  }
 0x511   : > { %1512 = vsyncadd (!%p1361_p10), %s1087_s11, 4294967280  ;;  %s25_s28 = sadd.s32 1, %s1961_s26   ;;  %s1964_s23 = sld [smem:[#allocation7_spill]] }
 0x512   : > { %p22_p11 = scmp.ge.s32.totalorder %s25_s28, 10   ;;  %s1965_s13 = sld [smem:[#allocation16_spill]] }
 0x513   : > { %s1966_s24 = sld [smem:[#allocation9_spill]]  ;;  %s1967_s25 = sld [smem:[#allocation10_spill]] }
 0x514   : > { %s1968_s26 = sld [smem:[#allocation12_spill]]  ;;  %s1969_s27 = sld [smem:[#allocation14_spill]] }
 0x515   : > { %s1970_s21 = smov %s1519_s22  ;;  %24 = sbr.rel (!%p22_p11) target bundleno = 12 (0xc), region = 141 }
 0x517   : > { %s1971_s22 = smov %s1964_s23 }
 0x518   : > { %s1972_s23 = smov %s1965_s13 }
 0x51c   :  { %1091 = vsyncpa [#allocation4], 1 }
 0x51d   :  { %1093 = vsyncpa [#allocation4 + $0x1], 1 }

</bundles_post_ra>
